<compile_context>
chip_gen: v6e
topology: v6e:2x2x1
jax: 0.10.0
libtpu: 0.0.40
codegen_flags: <defaults>
</compile_context>

<pallas_src>
import functools

import jax
import jax.numpy as jnp
from jax import lax
from jax.experimental import pallas as pl
from jax.experimental.pallas import tpu as pltpu

_IGNORE_INDEX = -100


def _ce_partial_kernel(logits_ref, target_ref, psum_ref, pcnt_ref, *, n_rows):
    """One (TILE_N, C) row-tile -> (8, 128) partial NLL-sum and valid-count tiles."""
    step = pl.program_id(0)

    logits = logits_ref[...]                       # (tn, C), native dtype
    tgt = target_ref[...]                          # (tn, 1), int32
    tn, c = logits.shape

    # valid = not ignore_index AND inside the real (un-padded) row range.
    row = lax.broadcasted_iota(jnp.int32, (tn, 1), 0) + step * tn
    valid = (tgt != _IGNORE_INDEX) & (row < n_rows)          # (tn, 1) bool

    # Numerically stable shifted log-sum-exp in the native dtype (bf16 stays
    # bf16 on the VPU/EUP); only the row-sum accumulates in f32.
    m = jnp.max(logits, axis=-1, keepdims=True)              # (tn, 1) native
    shifted = logits - m                                     # (tn, C) native
    sum_exp = jnp.sum(jnp.exp(shifted), axis=-1, keepdims=True,
                      dtype=jnp.float32)                     # (tn, 1) f32
    lse = jnp.log(sum_exp)                                   # (tn, 1) f32

    # Gather the target's SHIFTED logit (the max cancels in lse - x[t]):
    # one-hot compare against a lane iota; at most one non-zero per row.
    col = lax.broadcasted_iota(jnp.int32, (tn, c), 1)
    tgt_shifted = jnp.sum(jnp.where(col == tgt, shifted, 0.0),
                          axis=-1, keepdims=True, dtype=jnp.float32)

    per_sample = jnp.where(valid, lse - tgt_shifted, 0.0)    # (tn, 1) f32
    total = jnp.sum(per_sample)                              # scalar f32
    count = jnp.sum(valid.astype(jnp.float32))               # scalar f32

    # Lane-dense (8, 128) partial tiles: value at [0, 0], zeros elsewhere,
    # so the wrapper's jnp.sum over all partials recovers the totals.
    r8 = lax.broadcasted_iota(jnp.int32, (8, 128), 0)
    c128 = lax.broadcasted_iota(jnp.int32, (8, 128), 1)
    first = (r8 == 0) & (c128 == 0)
    psum_ref[...] = jnp.where(first, total, 0.0)
    pcnt_ref[...] = jnp.where(first, count, 0.0)


def _vmem_capacity_bytes():
    try:
        info = pltpu.get_tpu_info()
        cap = getattr(info, "vmem_capacity_bytes", None)
        if cap:
            return int(cap)
    except Exception:
        pass
    return 64 * 1024 * 1024          # conservative (v7x per-TC VMEM)


def _pick_tile_n(c, itemsize, target_bytes=4 * 1024 * 1024, max_rows=65536):
    """Rows per tile so one logits block is ~4 MiB (amortizes per-step overhead)."""
    rows = target_bytes // max(1, c * itemsize)
    rows = max(8, min(int(rows), max_rows))
    return (rows // 8) * 8


def _legalize_tile_n(tile_n, n):
    """Clamp tile_n so the block shape is legal for an (N, C) array."""
    tile_n = max(1, int(tile_n))
    if n < 8:
        return n                                  # block dim == full array dim
    if n % 8 == 0:
        tile_n = min(tile_n, n)
    else:
        tile_n = min(tile_n, (n // 8) * 8)        # last block is a partial block
    return max(8, (tile_n // 8) * 8)


def cross_entropy_loss(output, target, *, tile_n=None):
    """output: (N, C) float logits; target: (N,) int class indices."""
    n, c = output.shape
    itemsize = output.dtype.itemsize
    tgt2d = target.astype(jnp.int32).reshape(n, 1)

    vmem_cap = _vmem_capacity_bytes()
    vmem_budget = int(vmem_cap * 3 // 4)          # stay well under physical VMEM

    if tile_n is None:
        tile_n = _pick_tile_n(c, itemsize)
    tile_n = _legalize_tile_n(tile_n, n)
    # Keep double-buffered input + f32 temporaries inside the VMEM budget.
    while tile_n > 8 and 8 * tile_n * c * itemsize > vmem_budget:
        tile_n = _legalize_tile_n(tile_n // 2, n)

    num_blocks = pl.cdiv(n, tile_n)
    tile_bytes = tile_n * c * itemsize
    vmem_limit = max(16 * 1024 * 1024, min(vmem_budget, 8 * tile_bytes))

    cost = pl.CostEstimate(
        flops=int(6 * n * c),
        transcendentals=int(n * c),
        bytes_accessed=int(n * c * itemsize + n * 4
                           + 2 * 8 * 128 * num_blocks * 4),
    )

    kernel = functools.partial(_ce_partial_kernel, n_rows=n)

    part_sum, part_cnt = pl.pallas_call(
        kernel,
        out_shape=(
            jax.ShapeDtypeStruct((8, 128 * num_blocks), jnp.float32),
            jax.ShapeDtypeStruct((8, 128 * num_blocks), jnp.float32),
        ),
        grid_spec=pltpu.PrefetchScalarGridSpec(
            num_scalar_prefetch=0,
            grid=(num_blocks,),
            in_specs=[
                pl.BlockSpec((tile_n, c), lambda i: (i, 0)),
                pl.BlockSpec((tile_n, 1), lambda i: (i, 0)),
            ],
            out_specs=[
                pl.BlockSpec((8, 128), lambda i: (0, i)),
                pl.BlockSpec((8, 128), lambda i: (0, i)),
            ],
        ),
        compiler_params=pltpu.CompilerParams(
            dimension_semantics=("parallel",),     # independent blocks (megacore)
            vmem_limit_bytes=vmem_limit,
        ),
        cost_estimate=cost,
    )(output, tgt2d)

    total = jnp.sum(part_sum)
    count = jnp.sum(part_cnt)
    # reduction='mean': divide by #non-ignored targets (NaN if zero, as torch).
    return total / count


def _reference(output, target):
    # pure-JAX reference of nn.CrossEntropyLoss(reduction='mean', ignore_index=-100)
    logp = jax.nn.log_softmax(output.astype(jnp.float32), axis=-1)
    valid = target != _IGNORE_INDEX
    safe_t = jnp.where(valid, target, 0)
    nll = -jnp.take_along_axis(logp, safe_t[:, None], axis=-1)[:, 0]
    nll = jnp.where(valid, nll, 0.0)
    return jnp.sum(nll) / jnp.sum(valid.astype(jnp.float32))


if __name__ == "__main__":
    key = jax.random.PRNGKey(0)
    k1, k2, k3, k4 = jax.random.split(key, 4)

    # --- case 1: small single-tile case (module-scale example) ---
    N, C = 8, 32
    output = jax.random.normal(k1, (N, C), dtype=jnp.float32)
    target = jax.random.randint(k2, (N,), 0, C, dtype=jnp.int32)
    target = target.at[3].set(_IGNORE_INDEX)      # exercise ignore_index

    loss = cross_entropy_loss(output, target)
    jax.block_until_ready(loss)
    ref = _reference(output, target)
    assert jnp.allclose(loss, ref, rtol=1e-5, atol=1e-5), (loss, ref)

    # --- case 2: multi-block with a ragged last block (no wrapper padding) ---
    N2, C2 = 200, 128
    output2 = jax.random.normal(k3, (N2, C2), dtype=jnp.float32)
    target2 = jax.random.randint(k4, (N2,), 0, C2, dtype=jnp.int32)
    target2 = target2.at[0].set(_IGNORE_INDEX)
    target2 = target2.at[57].set(_IGNORE_INDEX)
    target2 = target2.at[199].set(_IGNORE_INDEX)

    loss2 = cross_entropy_loss(output2, target2, tile_n=64)   # 4 blocks, ragged tail
    jax.block_until_ready(loss2)
    ref2 = _reference(output2, target2)
    assert jnp.allclose(loss2, ref2, rtol=1e-5, atol=1e-5), (loss2, ref2)

    print("KERNEL_OK")
</pallas_src>

<mosaic_0001>
module attributes {stable_mosaic.version = 11 : i64} {
  func.func @_ce_partial_kernel(%arg0: i32, %arg1: memref<8x32xf32, #tpu.memory_space<vmem>>, %arg2: memref<8x1xi32, #tpu.memory_space<vmem>>, %arg3: memref<8x128xf32, #tpu.memory_space<vmem>>, %arg4: memref<8x128xf32, #tpu.memory_space<vmem>>) attributes {dimension_semantics = [#tpu.dimension_semantics<parallel>], iteration_bounds = array<i64: 1>, scalar_prefetch = 0 : i64, scratch_operands = 0 : i64, tpu.core_type = #tpu.core_type<tc>, window_params = [{transform_indices = @transform_0, window_bounds = array<i64: 8, 32>}, {transform_indices = @transform_1, window_bounds = array<i64: 8, 1>}, {transform_indices = @transform_2, window_bounds = array<i64: 8, 128>}, {transform_indices = @transform_3, window_bounds = array<i64: 8, 128>}]} {
    %c0 = arith.constant 0 : index
    %c0_0 = arith.constant 0 : index
    %0 = vector.load %arg1[%c0, %c0_0] : memref<8x32xf32, #tpu.memory_space<vmem>>, vector<8x32xf32>
    %c0_1 = arith.constant 0 : index
    %c0_2 = arith.constant 0 : index
    %1 = vector.load %arg2[%c0_1, %c0_2] : memref<8x1xi32, #tpu.memory_space<vmem>>, vector<8x1xi32>
    %2 = tpu.iota {dimensions = array<i32: 0>} : vector<8x1xi32>
    %c8_i32 = arith.constant 8 : i32
    %3 = arith.muli %arg0, %c8_i32 : i32
    %4 = vector.broadcast %3 : i32 to vector<8x1xi32>
    %5 = arith.addi %2, %4 : vector<8x1xi32>
    %c-100_i32 = arith.constant -100 : i32
    %6 = vector.broadcast %c-100_i32 : i32 to vector<8x1xi32>
    %7 = arith.cmpi ne, %1, %6 : vector<8x1xi32>
    %c8_i32_3 = arith.constant 8 : i32
    %8 = vector.broadcast %c8_i32_3 : i32 to vector<8x1xi32>
    %9 = arith.cmpi slt, %5, %8 : vector<8x1xi32>
    %10 = arith.andi %7, %9 : vector<8x1xi1>
    %cst = arith.constant dense<0xFF800000> : vector<8xf32>
    %11 = vector.multi_reduction <maximumf>, %0, %cst [1] : vector<8x32xf32> to vector<8xf32>
    %12 = vector.shape_cast %11 : vector<8xf32> to vector<8x1xf32>
    %13 = vector.broadcast %12 : vector<8x1xf32> to vector<8x32xf32>
    %14 = arith.subf %0, %13 : vector<8x32xf32>
    %15 = math.exp %14 : vector<8x32xf32>
    %cst_4 = arith.constant dense<0.000000e+00> : vector<8xf32>
    %16 = vector.multi_reduction <add>, %15, %cst_4 [1] : vector<8x32xf32> to vector<8xf32>
    %17 = vector.shape_cast %16 : vector<8xf32> to vector<8x1xf32>
    %18 = math.log %17 : vector<8x1xf32>
    %19 = tpu.iota {dimensions = array<i32: 1>} : vector<8x32xi32>
    %20 = vector.broadcast %1 : vector<8x1xi32> to vector<8x32xi32>
    %21 = arith.cmpi eq, %19, %20 : vector<8x32xi32>
    %cst_5 = arith.constant 0.000000e+00 : f32
    %22 = vector.broadcast %cst_5 : f32 to vector<8x32xf32>
    %23 = arith.select %21, %14, %22 : vector<8x32xi1>, vector<8x32xf32>
    %cst_6 = arith.constant dense<0.000000e+00> : vector<8xf32>
    %24 = vector.multi_reduction <add>, %23, %cst_6 [1] : vector<8x32xf32> to vector<8xf32>
    %25 = vector.shape_cast %24 : vector<8xf32> to vector<8x1xf32>
    %26 = arith.subf %18, %25 : vector<8x1xf32>
    %cst_7 = arith.constant 0.000000e+00 : f32
    %27 = vector.broadcast %cst_7 : f32 to vector<8x1xf32>
    %28 = arith.select %10, %26, %27 : vector<8x1xi1>, vector<8x1xf32>
    %29 = vector.shape_cast %28 : vector<8x1xf32> to vector<1x8x1xf32>
    %cst_8 = arith.constant dense<0.000000e+00> : vector<1xf32>
    %30 = vector.multi_reduction <add>, %29, %cst_8 [1, 2] : vector<1x8x1xf32> to vector<1xf32>
    %31 = vector.shape_cast %30 : vector<1xf32> to vector<1x1x1xf32>
    %32 = vector.extract %31[0, 0, 0] : f32 from vector<1x1x1xf32>
    %33 = arith.extui %10 : vector<8x1xi1> to vector<8x1xi32>
    %34 = arith.sitofp %33 : vector<8x1xi32> to vector<8x1xf32>
    %35 = vector.shape_cast %34 : vector<8x1xf32> to vector<1x8x1xf32>
    %cst_9 = arith.constant dense<0.000000e+00> : vector<1xf32>
    %36 = vector.multi_reduction <add>, %35, %cst_9 [1, 2] : vector<1x8x1xf32> to vector<1xf32>
    %37 = vector.shape_cast %36 : vector<1xf32> to vector<1x1x1xf32>
    %38 = vector.extract %37[0, 0, 0] : f32 from vector<1x1x1xf32>
    %39 = tpu.iota {dimensions = array<i32: 0>} : vector<8x128xi32>
    %40 = tpu.iota {dimensions = array<i32: 1>} : vector<8x128xi32>
    %c0_i32 = arith.constant 0 : i32
    %41 = vector.broadcast %c0_i32 : i32 to vector<8x128xi32>
    %42 = arith.cmpi eq, %39, %41 : vector<8x128xi32>
    %c0_i32_10 = arith.constant 0 : i32
    %43 = vector.broadcast %c0_i32_10 : i32 to vector<8x128xi32>
    %44 = arith.cmpi eq, %40, %43 : vector<8x128xi32>
    %45 = arith.andi %42, %44 : vector<8x128xi1>
    %cst_11 = arith.constant 0.000000e+00 : f32
    %46 = vector.broadcast %32 : f32 to vector<8x128xf32>
    %47 = vector.broadcast %cst_11 : f32 to vector<8x128xf32>
    %48 = arith.select %45, %46, %47 : vector<8x128xi1>, vector<8x128xf32>
    %c0_12 = arith.constant 0 : index
    %c0_13 = arith.constant 0 : index
    %49 = vector.load %arg3[%c0_12, %c0_13] : memref<8x128xf32, #tpu.memory_space<vmem>>, vector<8x128xf32>
    tpu.vector_store %arg3[%c0_12, %c0_13], %48 {strides = array<i32>} : memref<8x128xf32, #tpu.memory_space<vmem>>, vector<8x128xf32>,
    %cst_14 = arith.constant 0.000000e+00 : f32
    %50 = vector.broadcast %38 : f32 to vector<8x128xf32>
    %51 = vector.broadcast %cst_14 : f32 to vector<8x128xf32>
    %52 = arith.select %45, %50, %51 : vector<8x128xi1>, vector<8x128xf32>
    %c0_15 = arith.constant 0 : index
    %c0_16 = arith.constant 0 : index
    %53 = vector.load %arg4[%c0_15, %c0_16] : memref<8x128xf32, #tpu.memory_space<vmem>>, vector<8x128xf32>
    tpu.vector_store %arg4[%c0_15, %c0_16], %52 {strides = array<i32>} : memref<8x128xf32, #tpu.memory_space<vmem>>, vector<8x128xf32>,
    return
  }
  func.func @transform_0(%arg0: i32) -> (i32, i32) {
    %c0_i32 = arith.constant 0 : i32
    %c0_i32_0 = arith.constant 0 : i32
    return %arg0, %c0_i32 : i32, i32
  }
  func.func @transform_1(%arg0: i32) -> (i32, i32) {
    %c0_i32 = arith.constant 0 : i32
    %c0_i32_0 = arith.constant 0 : i32
    return %arg0, %c0_i32 : i32, i32
  }
  func.func @transform_2(%arg0: i32) -> (i32, i32) {
    %c0_i32 = arith.constant 0 : i32
    %c0_i32_0 = arith.constant 0 : i32
    return %c0_i32, %arg0 : i32, i32
  }
  func.func @transform_3(%arg0: i32) -> (i32, i32) {
    %c0_i32 = arith.constant 0 : i32
    %c0_i32_0 = arith.constant 0 : i32
    return %c0_i32, %arg0 : i32, i32
  }
}

</mosaic_0001>

<bundles_post_ra>
// kernel: tpu_custom_call.1
= control target key start
LH: loop header
LB: loop body
LE: loop exit
PB: predicated region body
PF: predicated region fallthrough
CT: control target
= control target key end

     0   :  { %9 = vsyncpa [#allocation3], 0  ;;  %vm25_vm0 = vcmask 261120   ;;  %s214_s0 = inlined_call_operand.vmem [shape: f32[8,32], index: 0, kind: input, shape index: {}]   ;;  %s215_s1 = inlined_call_operand.vmem [shape: s32[8,1], index: 1, kind: input, shape index: {}]   ;;  %s216_s2 = inlined_call_operand.hbm [shape: f32[8,128], index: 2, kind: output, shape index: {0}]   ;;  %s217_s3 = inlined_call_operand.hbm [shape: f32[8,128], index: 3, kind: output, shape index: {1}]  }
   0x1   :  { %v15_v0 = vld [vmem:[%s214_s0] sm:$0xff] }
   0x2   :  { %10 = vsyncpa [#allocation5], 0  ;;  %v26_v1 = vsel %vm25_vm0, %v15_v0, -inf  ;;  %v167_v2 = vmov 0   ;;  %v16_v3 = vld [vmem:[%s215_s1] sm:$0xff]  ;;  %v17_v7 = vlaneseq  ;;  %vm49_vm3 = vcmask 7168  }
   0x3   :  { %118 = vset.pattern.permute.xlu0 %v167_v2  ;;  %vm22_vm2 = vcmp.ne.s32.totalorder %v16_v3, 4294967196  ;;  %v168_v20 = vmov 0.0   ;;  %s169_s0 = smov [#allocation2]   ;;  %s170_s17 = smov [#allocation4]  }
   0x4   :  { %27 = vmax.xlane.f32.xlu0 %v26_v1  ;;  %v38_v8 = vand.u32 127, %v17_v7  ;;  %v109_v21 = vsel %vm22_vm2, 1.0, %v168_v20  ;;  %v18_v38 = vshrl.u32 %v17_v7, 7  ;;  %s87_s1 = sshll.u32 %s169_s0, 4  ;;  %s97_s18 = sshll.u32 %s170_s17, 4  ;;  %s88_s1 = int_to_ptr.vmem [resolvable:$true] %s87_s1  ;;  %s98_s18 = int_to_ptr.vmem [resolvable:$true] %s97_s18 }
   0x5   :  { %v62_v23 = vsel %vm49_vm3, %v109_v21, 0.0  ;;  %s123_s20 = scalar_lea.vmem %s88_s1, 128  ;;  %p128_p1 = scmp.lt.s32.totalorder %s88_s1, %s88_s1 }
   0x6   :  { %vm72_vm4 = vcmp.eq.s32.totalorder %v18_v38, 0  ;;  %vm73_vm5 = vcmp.eq.s32.totalorder %v38_v8, 0  ;;  %p124_p0 = scmp.ne.s32.totalorder %s88_s1, %s123_s20  ;;  %p129_p2 = scmp.lt.s32.totalorder %s123_s20, %s123_s20 }
   0x7   :  { %vm200_vm6 = vmand %vm72_vm4, %vm73_vm5 }
   0x8   :  { %p130_p3 = por %p129_p2, %p128_p1 }
   0xa   :  { %p131_p4 = pnand %p130_p3, %p124_p0 }
  0x1a   :  { %40 = vperm.xlu0 %118, %v16_v3  }
  0x8d   :  { %v28_v4 = vpop.xlane.xlu0 %27 }
  0x8e   :  { %v29_v5 = vsub.f32 %v15_v0, %v28_v4 }
  0x90   :  { %v30_v6 = vmul.f32 1.442695, %v29_v5 }
  0x92   :  { %119 = vpow2.f32 %v30_v6 }
  0x95   :  { %v41_v9 = vpop.permute.xlu0 %40 }
  0x96   :  { %vm42_vm1 = vcmp.eq.s32.totalorder %v38_v8, %v41_v9 }
  0x97   :  { %v43_v12 = vsel %vm42_vm1, %v29_v5, 0.0 }
  0x98   :  { %v44_v13 = vsel %vm25_vm0, %v43_v12, 0.0 }
  0x9f   :  { %v120_v10 = vpop.eup %119 }
  0xa0   :  { %v32_v11 = vsel %vm25_vm0, %v120_v10, 0.0 }
  0xa1   :  { %33 = vadd.xlane.f32.xlu1 %v32_v11 }
  0xa5   :  { %45 = vadd.xlane.f32.xlu1 %v44_v13 }
 0x12a   :  { %v34_v14 = vpop.xlane.xlu1 %33 }
 0x12b   :  { %121 = vlog2.f32 %v34_v14 }
 0x12e   :  { %v46_v17 = vpop.xlane.xlu1 %45 }
 0x138   :  { %v122_v15 = vpop.eup %121 }
 0x139   :  { %v36_v16 = vmul.f32 0.6931472, %v122_v15 }
 0x13b   :  { %v47_v18 = vsub.f32 %v36_v16, %v46_v17 }
 0x13d   :  { %v48_v19 = vsel %vm22_vm2, %v47_v18, 0.0 }
 0x13e   :  { %v50_v22 = vsel %vm49_vm3, %v48_v19, 0.0 }
 0x13f   :  { %51 = vadd.xlane.f32.xlu1 %v50_v22 }
 0x143   :  { %63 = vadd.xlane.f32.xlu1 %v62_v23 }
 0x1c8   :  { %v52_v24 = vpop.xlane.xlu1 %51 }
 0x1c9   :  { %v53_v25 = vrot.slane %v52_v24, 4 }
 0x1cb   :  { %v54_v26 = vadd.f32 %v53_v25, %v52_v24 }
 0x1cc   :  { %v64_v27 = vpop.xlane.xlu1 %63 }
 0x1cd   :  { %v55_v28 = vrot.slane %v54_v26, 2  ;;  %v65_v29 = vrot.slane %v64_v27, 4 }
 0x1cf   :  { %v66_v30 = vadd.f32 %v65_v29, %v64_v27  ;;  %v56_v31 = vadd.f32 %v55_v28, %v54_v26 }
 0x1d1   :  { %v67_v32 = vrot.slane %v66_v30, 2  ;;  %v57_v33 = vrot.slane %v56_v31, 1 }
 0x1d3   :  { %v68_v34 = vadd.f32 %v67_v32, %v66_v30  ;;  %v58_v35 = vadd.f32 %v57_v33, %v56_v31 }
 0x1d5   :  { %110 = vpush %v58_v35  ;;  %v69_v36 = vrot.slane %v68_v34, 1 }
 0x1d7   :  { %v70_v37 = vadd.f32 %v69_v36, %v68_v34 }
 0x1d9   :  { %112 = vpush %v70_v37 }
 0x206   :  { %s111_s16 = spop %110 }
 0x207   :  { %v75_v40 = vstv %s111_s16 }
 0x208   :  { %v76_v41 = vsel %vm200_vm6, %v75_v40, 0.0 }
 0x209   :  { %77 = vst [vmem:[#allocation2] sm:$0xff] %v76_v41 }
 0x20a   :  { %s113_s19 = spop %112 }
 0x20b   :  { %v78_v42 = vstv %s113_s19 }
 0x20c   :  { %134 = shalt.err (!%p131_p4)
}
 0x20d   :  { %90 = dma.vmem_to_hbm [thread:$0]  %s88_s1, 128, %s216_s2, [#allocation3]   ;;  %v79_v43 = vsel %vm200_vm6, %v78_v42, 0.0 }
 0x20e   :  { %80 = vst [vmem:[#allocation4] sm:$0xff] %v79_v43  ;;  %s143_s23 = scalar_lea.vmem %s98_s18, 128  ;;  %p148_p6 = scmp.lt.s32.totalorder %s98_s18, %s98_s18 }
 0x20f   :  { %p144_p5 = scmp.ne.s32.totalorder %s98_s18, %s143_s23  ;;  %p149_p7 = scmp.lt.s32.totalorder %s143_s23, %s143_s23 }
 0x211   :  { %p150_p8 = por %p149_p7, %p148_p6 }
 0x213   :  { %p151_p9 = pnand %p150_p8, %p144_p5 }
 0x215   :  { %154 = shalt.err (!%p151_p9)
}
 0x216   :  { %100 = dma.vmem_to_hbm [thread:$0]  %s98_s18, 128, %s217_s3, [#allocation5]  }
 0x217   :  { %163 = dma.done.wait [#allocation3], 128  }
 0x218   :  { %164 = vsyncadd [#allocation3], 4294967168 }
 0x219   :  { %165 = dma.done.wait [#allocation5], 128  }
 0x21a   :  { %166 = vsyncadd [#allocation5], 4294967168 }
 0x21b   :  { %107 = vsyncpa [#allocation3], 1 }
 0x21c   :  { %108 = vsyncpa [#allocation5], 1 }

</bundles_post_ra>
